<compile_context>
chip_gen: v7x
topology: tpu7x:2x2x1
jax: 0.10.0
libtpu: 0.0.40
codegen_flags: <defaults>
</compile_context>

<pallas_src>
import functools
import math

import jax
import jax.numpy as jnp
import numpy as np
from jax.experimental import pallas as pl
from jax.experimental.pallas import tpu as pltpu

INF = 1e20


def graph_learner_kernel(xm_ref, xmT_ref, w_ref, wT_ref, adj_ref, h_t_ref, *,
                         inv_num_pers, epsilon, exp_bf16):
    # xm_ref : (1, TN, D) bf16   masked feature rows of this tile
    # xmT_ref: (1, D, N)  bf16   masked features, transposed (whole graph)
    # w_ref  : (D, PHp)   bf16   fused + padded perspective weights
    # wT_ref : (PHp, D)   bf16   its transpose
    # h_t_ref: VMEM scratch (PHp, N) bf16, carried across row tiles (j axis).
    j = pl.program_id(1)

    # Once per batch element: hidden projection in transposed (PH, N) layout so
    # every Gram tile below is a standard (TN,PH)@(PH,N) MXU contraction.
    @pl.when(j == 0)
    def _():
        ht = jnp.dot(wT_ref[...], xmT_ref[0],               # (PHp, N) f32
                     preferred_element_type=jnp.float32)
        h_t_ref[...] = jnp.maximum(ht, 0.0).astype(h_t_ref.dtype)

    # Project this tile's rows (cheap: TN*D*PHp MACs) and contract against
    # h_all^T: sum_p H_p H_p^T == H_all H_all^T.
    h_rows = jnp.maximum(
        jnp.dot(xm_ref[0], w_ref[...], preferred_element_type=jnp.float32),
        0.0).astype(jnp.bfloat16)                            # (TN, PHp)
    scores = jnp.dot(h_rows, h_t_ref[...],                   # (TN, N) f32
                     preferred_element_type=jnp.float32)

    # mean over perspectives + sigmoid (f32: keeps the epsilon cut stable).
    att = jax.nn.sigmoid(scores * inv_num_pers)
    att = jnp.where(att > epsilon, att, -INF)                # epsilonNN
    att = att - jnp.max(att, axis=-1, keepdims=True)         # row softmax
    if exp_bf16:                                             # bf16 EUP on v6e/v7x
        e = jnp.exp(att.astype(jnp.bfloat16)).astype(jnp.float32)
    else:
        e = jnp.exp(att)
    inv_denom = pl.reciprocal(jnp.sum(e, axis=-1, keepdims=True), approx=True)
    adj_ref[0] = (e * inv_denom).astype(adj_ref.dtype)


def _auto_row_tile(N, D, PHp, adj_bytes, vmem_budget, gran):
    """Largest row tile whose per-step VMEM fits the budget (and divides N)."""
    # Tile-independent per-step VMEM: masked^T block (x2 double-buffered),
    # both weight blocks (x2 each), h_all^T scratch.
    fixed = 2 * (D * N * 2) + 2 * 2 * (D * PHp * 2) + N * PHp * 2
    # Per adjacency row: masked rows bf16 (x2), adj out block (x2),
    # ~3 f32 (TN,N) temporaries (scores/att/e), projected row f32+bf16.
    per_row = 2 * (D * 2) + 2 * N * adj_bytes + 3 * N * 4 + 6 * PHp
    avail = vmem_budget - fixed - (2 << 20)                  # 2 MiB slack
    if avail <= 0:
        return N   # degenerate (huge N*PHp): punt to full-N; see TODO above.
    tn_max = min(avail // per_row, 1024)                     # diminishing returns past ~512
    if tn_max >= N:
        return N
    for step in (gran, 8):                                   # prefer MXU-friendly multiples
        t = (tn_max // step) * step
        while t >= step:
            if N % t == 0:
                return t
            t -= step
    return N                                                 # no clean divisor: full-N


def graph_learner_forward(x, z, feat_mask, weights, *, epsilon,
                          row_tile=None, vmem_limit_bytes=None,
                          adj_dtype=jnp.float32):
    B, N, D = x.shape
    P, H, _ = weights.shape
    PH = P * H
    PHp = max(128, ((PH + 127) // 128) * 128)   # lane-dense pad; exact (relu(0)=0)

    # --- XLA-side work (trivially HBM-bound / free layout plumbing) ----------
    # mask_feature(marginalize=True); returned directly as the module's first output.
    masked = x + z * (1.0 - jax.nn.sigmoid(feat_mask))[None, None, :]
    xm = masked.astype(jnp.bfloat16)            # (B, N, D)
    xmT = jnp.swapaxes(xm, 1, 2)                # (B, D, N)

    # Fuse the P per-perspective weights into one (D, PHp) bf16 matrix.
    w_all = jnp.transpose(weights, (2, 0, 1)).reshape(D, PH)
    w_all = jnp.pad(w_all, ((0, 0), (0, PHp - PH))).astype(jnp.bfloat16)
    w_all_T = w_all.T                           # (PHp, D)

    # --- Chip-dependent defaults ---------------------------------------------
    kind = ""
    try:
        kind = jax.devices()[0].device_kind.lower()
    except Exception:
        pass
    is_v5_class = any(v in kind for v in ("v2", "v3", "v4", "v5"))
    exp_bf16 = not is_v5_class                  # bf16 EUP only on v6e/v7x

    if vmem_limit_bytes is None:
        try:
            cap = int(pltpu.get_tpu_info().vmem_capacity_bytes)
        except Exception:
            cap = 64 * 1024 * 1024              # conservative (v7x physical)
        vmem_limit_bytes = int(0.75 * cap)

    adj_bytes = jnp.dtype(adj_dtype).itemsize   # pass adj_dtype=bf16 on v5e to halve writeback
    if row_tile is None:
        tn = _auto_row_tile(N, D, PHp, adj_bytes, vmem_limit_bytes,
                            gran=128 if is_v5_class else 256)
    else:
        tn = row_tile
    assert N % tn == 0 and (tn == N or tn % 8 == 0)

    kernel = functools.partial(graph_learner_kernel,
                               inv_num_pers=1.0 / float(P),
                               epsilon=float(epsilon),
                               exp_bf16=exp_bf16)

    adj = pl.pallas_call(
        kernel,
        out_shape=jax.ShapeDtypeStruct((B, N, N), adj_dtype),
        grid_spec=pltpu.PrefetchScalarGridSpec(
            num_scalar_prefetch=0,
            grid=(B, N // tn),
            in_specs=[
                pl.BlockSpec((1, tn, D), lambda b, j: (b, j, 0)),   # masked rows (bf16)
                pl.BlockSpec((1, D, N), lambda b, j: (b, 0, 0)),    # masked^T    (bf16)
                pl.BlockSpec((D, PHp), lambda b, j: (0, 0)),        # W_all
                pl.BlockSpec((PHp, D), lambda b, j: (0, 0)),        # W_all^T
            ],
            out_specs=pl.BlockSpec((1, tn, N), lambda b, j: (b, j, 0)),  # adjacency row tile
            scratch_shapes=[pltpu.VMEM((PHp, N), jnp.bfloat16)],    # h_all^T, carried over j
        ),
        compiler_params=pltpu.CompilerParams(
            # j axis MUST stay "arbitrary": h_all^T scratch is carried across
            # row tiles and (re)built under pl.when(j == 0).
            dimension_semantics=("parallel", "arbitrary"),
            vmem_limit_bytes=vmem_limit_bytes),
    )(xm, xmT, w_all, w_all_T)

    return masked, adj


def reference_forward(x, z, feat_mask, weights, *, epsilon):
    keep = jax.nn.sigmoid(feat_mask)[None, None, :]
    masked = x + z * (1.0 - keep)
    h = jnp.maximum(jnp.einsum('bnd,phd->pbnh', masked, weights), 0.0)
    att = jnp.einsum('pbnh,pbmh->pbnm', h, h).mean(0)
    att = jax.nn.sigmoid(att)
    m = (att > epsilon).astype(jnp.float32)
    att = att * m + (-INF) * (1.0 - m)
    adj = jax.nn.softmax(att, axis=-1)
    return masked, adj


if __name__ == "__main__":
    B, N, D, H, P = 2, 8, 16, 32, 4
    epsilon = 0.5

    key = jax.random.PRNGKey(0)
    kx, kz, kw = jax.random.split(key, 3)

    x = jax.random.normal(kx, (B, N, D), jnp.float32)
    # mask_feature noise: z ~ Normal(mean=-x, std=0.5) (sampled in plain JAX)
    z = -x + 0.5 * jax.random.normal(kz, (B, N, D), jnp.float32)
    # feat_mask: constant-0 init (construct_feat_mask('constant'))
    feat_mask = jnp.zeros((D,), jnp.float32)
    # nn.Linear(input, hidden, bias=False) weights: (P, H, D), uniform(-1/sqrt(D), 1/sqrt(D))
    bound = 1.0 / math.sqrt(D)
    weights = jax.random.uniform(kw, (P, H, D), jnp.float32, minval=-bound, maxval=bound)

    masked, adj = graph_learner_forward(x, z, feat_mask, weights, epsilon=epsilon)
    jax.block_until_ready((masked, adj))

    # sanity check against pure-JAX f32 reference
    ref_masked, ref_adj = reference_forward(x, z, feat_mask, weights, epsilon=epsilon)
    np.testing.assert_allclose(np.asarray(masked), np.asarray(ref_masked),
                               rtol=1e-5, atol=1e-5)
    np.testing.assert_allclose(np.asarray(adj), np.asarray(ref_adj),
                               rtol=1e-2, atol=1e-2)

    print("KERNEL_OK")
</pallas_src>

<mosaic_0001>
module attributes {stable_mosaic.version = 11 : i64} {
  func.func @graph_learner_kernel(%arg0: i32, %arg1: i32, %arg2: memref<1x8x16xbf16, #tpu.memory_space<vmem>>, %arg3: memref<1x16x8xbf16, #tpu.memory_space<vmem>>, %arg4: memref<16x128xbf16, #tpu.memory_space<vmem>>, %arg5: memref<128x16xbf16, #tpu.memory_space<vmem>>, %arg6: memref<1x8x8xf32, #tpu.memory_space<vmem>>, %arg7: memref<128x8xbf16, #tpu.memory_space<vmem>>) attributes {dimension_semantics = [#tpu.dimension_semantics<parallel>, #tpu.dimension_semantics<arbitrary>], iteration_bounds = array<i64: 2, 1>, scalar_prefetch = 0 : i64, scratch_operands = 1 : i64, tpu.core_type = #tpu.core_type<tc>, window_params = [{transform_indices = @transform_0, window_bounds = array<i64: 1, 8, 16>}, {transform_indices = @transform_1, window_bounds = array<i64: 1, 16, 8>}, {pipeline_mode = #tpu.pipeline_mode<synchronous>, transform_indices = @transform_2, window_bounds = array<i64: 16, 128>}, {pipeline_mode = #tpu.pipeline_mode<synchronous>, transform_indices = @transform_3, window_bounds = array<i64: 128, 16>}, {transform_indices = @transform_4, window_bounds = array<i64: 1, 8, 8>}]} {
    %c0_i32 = arith.constant 0 : i32
    %0 = arith.cmpi eq, %arg1, %c0_i32 : i32
    %1 = arith.extui %0 : i1 to i32
    %c0_i32_0 = arith.constant 0 : i32
    %2 = arith.cmpi ne, %1, %c0_i32_0 : i32
    scf.if %2 {
      %c0_18 = arith.constant 0 : index
      %c0_19 = arith.constant 0 : index
      %38 = vector.load %arg5[%c0_18, %c0_19] : memref<128x16xbf16, #tpu.memory_space<vmem>>, vector<128x16xbf16>
      %c0_20 = arith.constant 0 : index
      %c0_21 = arith.constant 0 : index
      %c0_22 = arith.constant 0 : index
      %39 = vector.load %arg3[%c0_20, %c0_21, %c0_22] : memref<1x16x8xbf16, #tpu.memory_space<vmem>>, vector<1x16x8xbf16>
      %40 = vector.shape_cast %39 : vector<1x16x8xbf16> to vector<16x8xbf16>
      %cst_23 = arith.constant dense<0.000000e+00> : vector<128x8xf32>
      %41 = tpu.matmul %38, %40, %cst_23 {dimension_numbers = #tpu.dot_dimension_numbers<[1], [0], [0], [1], [0, 0, 1, 1], [], []>} : vector<128x16xbf16>, vector<16x8xbf16>, vector<128x8xf32> -> vector<128x8xf32>
      %cst_24 = arith.constant 0.000000e+00 : f32
      %42 = vector.broadcast %cst_24 : f32 to vector<128x8xf32>
      %43 = arith.maximumf %41, %42 : vector<128x8xf32>
      %44 = arith.truncf %43 : vector<128x8xf32> to vector<128x8xbf16>
      %c0_25 = arith.constant 0 : index
      %c0_26 = arith.constant 0 : index
      %45 = vector.load %arg7[%c0_25, %c0_26] : memref<128x8xbf16, #tpu.memory_space<vmem>>, vector<128x8xbf16>
      tpu.vector_store %arg7[%c0_25, %c0_26], %44 {strides = array<i32>} : memref<128x8xbf16, #tpu.memory_space<vmem>>, vector<128x8xbf16>,
    } else {
    }
    %c0 = arith.constant 0 : index
    %c0_1 = arith.constant 0 : index
    %c0_2 = arith.constant 0 : index
    %3 = vector.load %arg2[%c0, %c0_1, %c0_2] : memref<1x8x16xbf16, #tpu.memory_space<vmem>>, vector<1x8x16xbf16>
    %4 = vector.shape_cast %3 : vector<1x8x16xbf16> to vector<8x16xbf16>
    %c0_3 = arith.constant 0 : index
    %c0_4 = arith.constant 0 : index
    %5 = vector.load %arg4[%c0_3, %c0_4] : memref<16x128xbf16, #tpu.memory_space<vmem>>, vector<16x128xbf16>
    %cst = arith.constant dense<0.000000e+00> : vector<8x128xf32>
    %6 = tpu.matmul %4, %5, %cst {dimension_numbers = #tpu.dot_dimension_numbers<[1], [0], [0], [1], [0, 0, 1, 1], [], []>} : vector<8x16xbf16>, vector<16x128xbf16>, vector<8x128xf32> -> vector<8x128xf32>
    %cst_5 = arith.constant 0.000000e+00 : f32
    %7 = vector.broadcast %cst_5 : f32 to vector<8x128xf32>
    %8 = arith.maximumf %6, %7 : vector<8x128xf32>
    %9 = arith.truncf %8 : vector<8x128xf32> to vector<8x128xbf16>
    %c0_6 = arith.constant 0 : index
    %c0_7 = arith.constant 0 : index
    %10 = vector.load %arg7[%c0_6, %c0_7] : memref<128x8xbf16, #tpu.memory_space<vmem>>, vector<128x8xbf16>
    %cst_8 = arith.constant dense<0.000000e+00> : vector<8x8xf32>
    %11 = tpu.matmul %9, %10, %cst_8 {dimension_numbers = #tpu.dot_dimension_numbers<[1], [0], [0], [1], [0, 0, 1, 1], [], []>} : vector<8x128xbf16>, vector<128x8xbf16>, vector<8x8xf32> -> vector<8x8xf32>
    %cst_9 = arith.constant 2.500000e-01 : f32
    %12 = vector.broadcast %cst_9 : f32 to vector<8x8xf32>
    %13 = arith.mulf %11, %12 : vector<8x8xf32>
    %14 = arith.negf %13 : vector<8x8xf32>
    %15 = math.exp %14 : vector<8x8xf32>
    %cst_10 = arith.constant 1.000000e+00 : f32
    %16 = vector.broadcast %cst_10 : f32 to vector<8x8xf32>
    %17 = arith.addf %16, %15 : vector<8x8xf32>
    %18 = arith.divf %16, %17 : vector<8x8xf32>
    %cst_11 = arith.constant 5.000000e-01 : f32
    %19 = vector.broadcast %cst_11 : f32 to vector<8x8xf32>
    %20 = arith.cmpf ogt, %18, %19 : vector<8x8xf32>
    %cst_12 = arith.constant -1.000000e+20 : f32
    %21 = vector.broadcast %cst_12 : f32 to vector<8x8xf32>
    %22 = arith.select %20, %18, %21 : vector<8x8xi1>, vector<8x8xf32>
    %cst_13 = arith.constant dense<0xFF800000> : vector<8xf32>
    %23 = vector.multi_reduction <maximumf>, %22, %cst_13 [1] : vector<8x8xf32> to vector<8xf32>
    %24 = vector.shape_cast %23 : vector<8xf32> to vector<8x1xf32>
    %25 = vector.broadcast %24 : vector<8x1xf32> to vector<8x8xf32>
    %26 = arith.subf %22, %25 : vector<8x8xf32>
    %27 = arith.truncf %26 : vector<8x8xf32> to vector<8x8xbf16>
    %28 = math.exp %27 : vector<8x8xbf16>
    %29 = arith.extf %28 : vector<8x8xbf16> to vector<8x8xf32>
    %cst_14 = arith.constant dense<0.000000e+00> : vector<8xf32>
    %30 = vector.multi_reduction <add>, %29, %cst_14 [1] : vector<8x8xf32> to vector<8xf32>
    %31 = vector.shape_cast %30 : vector<8xf32> to vector<8x1xf32>
    %32 = tpu.reciprocal %31 {approx = true} : vector<8x1xf32> -> vector<8x1xf32>
    %33 = vector.broadcast %32 : vector<8x1xf32> to vector<8x8xf32>
    %34 = arith.mulf %29, %33 : vector<8x8xf32>
    %c0_15 = arith.constant 0 : index
    %c0_16 = arith.constant 0 : index
    %c0_17 = arith.constant 0 : index
    %35 = vector.load %arg6[%c0_15, %c0_16, %c0_17] : memref<1x8x8xf32, #tpu.memory_space<vmem>>, vector<1x8x8xf32>
    %36 = vector.shape_cast %35 : vector<1x8x8xf32> to vector<8x8xf32>
    %37 = vector.shape_cast %34 : vector<8x8xf32> to vector<1x8x8xf32>
    tpu.vector_store %arg6[%c0_15, %c0_16, %c0_17], %37 {strides = array<i32>} : memref<1x8x8xf32, #tpu.memory_space<vmem>>, vector<1x8x8xf32>,
    return
  }
  func.func @transform_0(%arg0: i32, %arg1: i32) -> (i32, i32, i32) {
    %c0_i32 = arith.constant 0 : i32
    %c0_i32_0 = arith.constant 0 : i32
    return %arg0, %arg1, %c0_i32 : i32, i32, i32
  }
  func.func @transform_1(%arg0: i32, %arg1: i32) -> (i32, i32, i32) {
    %c0_i32 = arith.constant 0 : i32
    %c0_i32_0 = arith.constant 0 : i32
    %c0_i32_1 = arith.constant 0 : i32
    return %arg0, %c0_i32, %c0_i32_0 : i32, i32, i32
  }
  func.func @transform_2(%arg0: i32, %arg1: i32) -> (i32, i32) {
    %c0_i32 = arith.constant 0 : i32
    %c0_i32_0 = arith.constant 0 : i32
    %c0_i32_1 = arith.constant 0 : i32
    return %c0_i32, %c0_i32_0 : i32, i32
  }
  func.func @transform_3(%arg0: i32, %arg1: i32) -> (i32, i32) {
    %c0_i32 = arith.constant 0 : i32
    %c0_i32_0 = arith.constant 0 : i32
    %c0_i32_1 = arith.constant 0 : i32
    return %c0_i32, %c0_i32_0 : i32, i32
  }
  func.func @transform_4(%arg0: i32, %arg1: i32) -> (i32, i32, i32) {
    %c0_i32 = arith.constant 0 : i32
    %c0_i32_0 = arith.constant 0 : i32
    return %arg0, %arg1, %c0_i32 : i32, i32, i32
  }
}

</mosaic_0001>

<bundles_post_ra>
// kernel: tpu_custom_call.1
= control target key start
LH: loop header
LB: loop body
LE: loop exit
PB: predicated region body
PF: predicated region fallthrough
CT: control target
= control target key end

     0   :  { %9 = vsyncpa [#allocation4], 0  ;;  %s1147_s0 = inlined_call_operand.vmem [shape: bf16[2,8,16], index: 0, kind: input, shape index: {}]   ;;  %s1148_s1 = inlined_call_operand.vmem [shape: bf16[2,16,8], index: 1, kind: input, shape index: {}]   ;;  %s1149_s2 = inlined_call_operand.vmem [shape: bf16[16,128], index: 2, kind: input, shape index: {}]   ;;  %s1150_s3 = inlined_call_operand.vmem [shape: bf16[128,16], index: 3, kind: input, shape index: {}]   ;;  %s1151_s4 = inlined_call_operand.hbm [shape: f32[2,8,8], index: 4, kind: output, shape index: {}]  }
   0x1   :  { %11 = vsyncpa [#allocation4 + $0x1], 0  ;;  %s969_s15 = smov 0   ;;  %s971_s16 = smov 0  }
   0x2   :  { %s973_s17 = smov 0   ;;  %s975_s18 = smov 0  }
   0x3   :  { %s977_s19 = smov 0   ;;  %s979_s20 = smov 0  }
   0x4 LB: > { %s688_s21 = sadd.s32 4294967295, %s939_s20   ;;  %s689_s22 = sadd.s32 4294967294, %s939_s20   ;;  %s939_s20 = sphi %s979_s20, %s17_s20   ;;  %s935_s19 = sphi %s977_s19, %s1158_s19   ;;  %s931_s18 = sphi %s975_s18, %s1157_s18   ;;  %s927_s17 = sphi %s973_s17, %s1156_s17   ;;  %s923_s16 = sphi %s971_s16, %s1155_s16   ;;  %s919_s15 = sphi %s969_s15, %s1154_s15  }
   0x5   : > { %s29_s23 = sadd.s32 1, %s935_s19  ;;  %s134_s24 = sadd.s32 1, %s927_s17 }
   0x6   : > { %p31_p0 = scmp.ge.s32.totalorder %s29_s23, 2  ;;  %p144_p1 = scmp.ne.s32.totalorder %s927_s17, %s923_s16 }
   0x7   : > { %p145_p2 = scmp.eq.s32.totalorder %s688_s21, 1  ;;  %p150_p3 = scmp.ne.s32.totalorder %s923_s16, %s919_s15 }
   0x8   : > { %s1160_s23 = smov (%p31_p0, %s29_s23), 0  ;;  %p151_p5 = scmp.eq.s32.totalorder %s689_s22, 1 }
   0x9   : > { %p1009_p4 = por %p145_p2, %p144_p1  ;;  %s129_s26 = ssub.s32 %s935_s19, %s1160_s23 }
   0xa   : > { %p692_p6 = scmp.ge.s32.totalorder %s939_s20, 1  ;;  %p132_p7 = scmp.eq.s32.totalorder %s129_s26, 0 }
   0xb   : > { %p1016_p8 = por %p151_p5, %p150_p3  ;;  %p193_p9 = scmp.lt.s32.totalorder %s939_s20, 3 }
   0xc   : > { %s1022_s28 = scalar_select %p132_p7, %s927_s17, %s134_s24  }
   0xd   : > { %p194_p10 = pnand %p692_p6, %p193_p9 }
   0xe   : > { %p226_p11 = scmp.lt.s32.totalorder (!%p194_p10), %s931_s18, 1  ;;  %v844_v0 = vld [vmem:[%s1150_s3] sm:$0xff] (!%p194_p10)   ;;  %vm307_vm0 = vcmask (!%p194_p10), 130048   ;;  %v941_v1 = vmov (!%p194_p10), 0.0   ;;  %vm942_vm1 = vmmov (!%p194_p10), 0   ;;  %v845_v3 = vld [vmem:[%s1150_s3 + $0x8] sm:$0xff] (!%p194_p10)  }
   0xf   : > { %197 = sbr.rel (%p194_p10) target bundleno = 864 (0x360), region = 36  ;;  %744 = vmatprep.mubr.msk.bf16.mxu0 (!%p194_p10), %vm307_vm0, %v844_v0  ;;  %760 = vmatprep.subr.bf16.mxu1 (!%p194_p10), %v941_v1  ;;  %v846_v4 = vld [vmem:[%s1150_s3 + $0x10] sm:$0xff] (!%p194_p10)   ;;  %v852_v5 = vld [vmem:[%s1149_s2] sm:$0xff] (!%p194_p10)   ;;  %v847_v7 = vld [vmem:[%s1150_s3 + $0x18] sm:$0xff] (!%p194_p10)   ;;  %vm453_vm2 = vcmask (!%p194_p10), 64512   ;;  %s223_s14 = sand.u32 (!%p194_p10), 1, %s923_s16  }
  0x10   : > { %762 = vmatprep.mubr.msk.bf16.mxu1 (!%p194_p10), %vm942_vm1, %v941_v1  ;;  %761 = vmatpush3.bf16.msra.mxu1 (!%p194_p10), %v852_v5  ;;  %v848_v8 = vld [vmem:[%s1150_s3 + $0x20] sm:$0xff] (!%p194_p10)   ;;  %v849_v9 = vld [vmem:[%s1150_s3 + $0x28] sm:$0xff] (!%p194_p10)   ;;  %v850_v10 = vld [vmem:[%s1150_s3 + $0x30] sm:$0xff] (!%p194_p10)   ;;  %s693_s21 = sshll.u32 (!%p194_p10), %s223_s14, 3  ;;  %s718_s22 = sshll.u32 (!%p194_p10), %s931_s18, 7 }
  0x11   : > { %v851_v11 = vld [vmem:[%s1150_s3 + $0x38] sm:$0xff] (!%p194_p10)  }
  0x16   : > { %s227_s5 = scalar_select %p226_p11, %s931_s18, 1 }
  0x17   : > { %s943_s18 = smov [#allocation3]  }
  0x18   : > { %s721_s6 = sshll.u32 %s227_s5, 3  ;;  %s694_s10 = sshll.u32 %s227_s5, 2 }
  0x19   : > { %s237_s9 = scalar_lea.vmem %s1148_s1, %s721_s6  ;;  %s232_s24 = scalar_lea.vmem %s1147_s0, %s694_s10 }
  0x1a   : > { %v843_v2 = vld [vmem:[%s237_s9] sm:$0xff]   ;;  %s1099_s5 = scalar_lea.hbm %s1151_s4, %s718_s22  ;;  %s591_s6 = scalar_lea.sflag [#allocation4], %s223_s14 }
  0x1b   : > { %742 = vmatprep.subr.bf16.mxu0 %v843_v2  ;;  %v462_v6 = vld [vmem:[%s232_s24] sm:$0xf]  ;;  %s225_s24 = scalar_lea.vmem [#allocation3], %s693_s21  ;;  %s865_s8 = sshll.u32 %s943_s18, 4  ;;  %s866_s8 = int_to_ptr.vmem [resolvable:$false] %s865_s8 }
  0x1c   : > { %743 = vmatpush3.bf16.msra.mxu0 %v843_v2  ;;  %763 = vmatmul.mubr.msk.bf16.vlgmr.msra.gmra.mrb[0].mxu1 %vm307_vm0, %v462_v6  ;;  %s605_s26 = sshll.u32 %s225_s24, 4  ;;  %s867_s9 = scalar_lea.vmem %s866_s8, 256  ;;  %s1101_s26 = int_to_ptr.vmem [resolvable:$true] %s605_s26 }
  0x1d   : > { %766 = vmatprep.subr.bf16.mxu0 %v941_v1  ;;  %s861_s7 = scalar_lea.vmem %s1101_s26, 128  ;;  %p868_p1 = scmp.lt.s32.totalorder %s1101_s26, %s866_s8 }
  0x1e   : > { %p862_p12 = scmp.ne.s32.totalorder %s1101_s26, %s861_s7  ;;  %p869_p2 = scmp.lt.s32.totalorder %s867_s9, %s861_s7 }
  0x1f   : > { %745 = vmatmul.mubr.msk.bf16.vlgmr.msra.gmra.mrb[0].mxu0 %vm307_vm0, %v845_v3 }
  0x20   : > { %748 = vmatprep.mubr.msk.bf16.mxu0 %vm307_vm0, %v846_v4  ;;  %p863_p13 = pnand %p862_p12, %p1009_p4  ;;  %p870_p3 = por %p869_p2, %p868_p1 }
  0x22   : > { %p864_p0 = pneg %p863_p13 }
  0x24   : > { %p871_p5 = pnand %p870_p3, %p864_p0 }
  0x27   : > { %749 = vmatmul.mubr.msk.bf16.gmra.mrb[4].mxu0 %vm307_vm0, %v847_v7 }
  0x28   : > { %752 = vmatprep.mubr.msk.bf16.mxu0 %vm307_vm0, %v848_v8 }
  0x2f   : > { %753 = vmatmul.mubr.msk.bf16.gmra.mrb[8].mxu0 %vm307_vm0, %v849_v9 }
  0x30   : > { %756 = vmatprep.mubr.msk.bf16.mxu0 %vm307_vm0, %v850_v10 }
  0x37   : > { %757 = vmatmul.mubr.msk.bf16.gmra.mrb[12].mxu0 %vm307_vm0, %v851_v11 }
  0x38   : > { %782 = vmatprep.mubr.msk.bf16.mxu0 %vm942_vm1, %v941_v1 }
  0xef   : > { %v1074_v15 = vpop.f32.mrb[0].mxu1 }
  0xf0   : > { %v764_v19 = vpop.f32.mrb[1].mxu1  ;;  %v515_v62 = vmax.f32 %v1074_v15, 0.0 }
  0xf1   : > { %v512_v22 = vpop.f32.mrb[2].mxu1 }
  0xf2   : > { %v746_v12 = vpop.f32.mrb[0].mxu0  ;;  %v765_v24 = vpop.f32.mrb[3].mxu1  ;;  %v516_v0 = vpack.c.bf16 %v515_v62, %v515_v62 }
  0xf3   : > { %v366_v13 = vpop.f32.mrb[1].mxu0  ;;  %v431_v16 = vmax.f32 %v746_v12, 0.0 }
  0xf4   : > { %v747_v14 = vpop.f32.mrb[2].mxu0  ;;  %v429_v20 = vmax.f32 %v366_v13, 0.0 }
  0xf5   : > { %v432_v17 = vmax.f32 %v747_v14, 0.0  ;;  %v369_v18 = vpop.f32.mrb[3].mxu0 }
  0xf6   : > { %v430_v21 = vmax.f32 %v369_v18, 0.0 }
  0xf7   : > { %v446_v23 = vpack.c.bf16 %v432_v17, %v431_v16 }
  0xf8   : > { %v445_v25 = vpack.c.bf16 %v430_v21, %v429_v20 }
  0xf9   : > { %455 = vst.msk [vmem:[#allocation2 + $0x8] sm:$0xff] %vm453_vm2, %v446_v23 }
  0xfa   : > { %454 = vst.msk [vmem:[#allocation2] sm:$0xff] %vm453_vm2, %v445_v25  ;;  %v750_v26 = vpop.f32.mrb[4].mxu0 }
  0xfb   : > { %v382_v27 = vpop.f32.mrb[5].mxu0  ;;  %v435_v29 = vmax.f32 %v750_v26, 0.0 }
  0xfc   : > { %v751_v28 = vpop.f32.mrb[6].mxu0  ;;  %v433_v32 = vmax.f32 %v382_v27, 0.0 }
  0xfd   : > { %v436_v30 = vmax.f32 %v751_v28, 0.0  ;;  %v385_v31 = vpop.f32.mrb[7].mxu0 }
  0xfe   : > { %v434_v33 = vmax.f32 %v385_v31, 0.0 }
  0xff   : > { %v448_v34 = vpack.c.bf16 %v436_v30, %v435_v29 }
 0x100   : > { %v447_v35 = vpack.c.bf16 %v434_v33, %v433_v32  ;;  %v518_v43 = vld [vmem:[#allocation2 + $0x8] sm:$0xff] }
 0x101   : > { %457 = vst.msk [vmem:[#allocation2 + $0x18] sm:$0xff] %vm453_vm2, %v448_v34  ;;  %v517_v36 = vld [vmem:[#allocation2] sm:$0xff] }
 0x102   : > { %456 = vst.msk [vmem:[#allocation2 + $0x10] sm:$0xff] %vm453_vm2, %v447_v35  ;;  %v754_v37 = vpop.f32.mrb[8].mxu0  ;;  %767 = vmatpush3.bf16.msra.mxu0 %v517_v36 }
 0x103   : > { %v398_v38 = vpop.f32.mrb[9].mxu0  ;;  %768 = vmatprep.subr.bf16.mxu0 %v941_v1  ;;  %v439_v40 = vmax.f32 %v754_v37, 0.0 }
 0x104   : > { %v755_v39 = vpop.f32.mrb[10].mxu0  ;;  %v437_v44 = vmax.f32 %v398_v38, 0.0 }
 0x105   : > { %v440_v41 = vmax.f32 %v755_v39, 0.0  ;;  %v401_v42 = vpop.f32.mrb[11].mxu0 }
 0x106   : > { %v438_v45 = vmax.f32 %v401_v42, 0.0  ;;  %769 = vmatpush3.bf16.msra.mxu0 %v518_v43 }
 0x107   : > { %v450_v46 = vpack.c.bf16 %v440_v41, %v439_v40  ;;  %770 = vmatprep.subr.bf16.mxu0 %v941_v1 }
 0x108   : > { %v449_v47 = vpack.c.bf16 %v438_v45, %v437_v44  ;;  %v520_v55 = vld [vmem:[#allocation2 + $0x18] sm:$0xff] }
 0x109   : > { %459 = vst.msk [vmem:[#allocation2 + $0x28] sm:$0xff] %vm453_vm2, %v450_v46  ;;  %v519_v48 = vld [vmem:[#allocation2 + $0x10] sm:$0xff] }
 0x10a   : > { %458 = vst.msk [vmem:[#allocation2 + $0x20] sm:$0xff] %vm453_vm2, %v449_v47  ;;  %v758_v49 = vpop.f32.mrb[12].mxu0  ;;  %771 = vmatpush3.bf16.msra.mxu0 %v519_v48 }
 0x10b   : > { %v414_v50 = vpop.f32.mrb[13].mxu0  ;;  %772 = vmatprep.subr.bf16.mxu0 %v941_v1  ;;  %v443_v52 = vmax.f32 %v758_v49, 0.0 }
 0x10c   : > { %v759_v51 = vpop.f32.mrb[14].mxu0  ;;  %v441_v56 = vmax.f32 %v414_v50, 0.0 }
 0x10d   : > { %v444_v53 = vmax.f32 %v759_v51, 0.0  ;;  %v417_v54 = vpop.f32.mrb[15].mxu0 }
 0x10e   : > { %v442_v57 = vmax.f32 %v417_v54, 0.0  ;;  %773 = vmatpush3.bf16.msra.mxu0 %v520_v55 }
 0x10f   : > { %v452_v58 = vpack.c.bf16 %v444_v53, %v443_v52  ;;  %774 = vmatprep.subr.bf16.mxu0 %v941_v1 }
 0x110   : > { %v451_v59 = vpack.c.bf16 %v442_v57, %v441_v56  ;;  %v522_v61 = vld [vmem:[#allocation2 + $0x28] sm:$0xff] }
 0x111   : > { %461 = vst.msk [vmem:[#allocation2 + $0x38] sm:$0xff] %vm453_vm2, %v452_v58  ;;  %v521_v60 = vld [vmem:[#allocation2 + $0x20] sm:$0xff] }
 0x112   : > { %460 = vst.msk [vmem:[#allocation2 + $0x30] sm:$0xff] %vm453_vm2, %v451_v59  ;;  %775 = vmatpush3.bf16.msra.mxu0 %v521_v60 }
 0x113   : > { %776 = vmatprep.subr.bf16.mxu0 %v941_v1 }
 0x116   : > { %777 = vmatpush3.bf16.msra.mxu0 %v522_v61 }
 0x117   : > { %778 = vmatprep.subr.bf16.mxu0 %v941_v1 }
 0x118   : > { %v524_v2 = vld [vmem:[#allocation2 + $0x38] sm:$0xff] }
 0x119   : > { %v523_v63 = vld [vmem:[#allocation2 + $0x30] sm:$0xff] }
 0x11a   : > { %779 = vmatpush3.bf16.msra.mxu0 %v523_v63 }
 0x11b   : > { %780 = vmatprep.subr.bf16.mxu0 %v941_v1 }
 0x11e   : > { %781 = vmatpush3.bf16.msra.mxu0 %v524_v2 }
 0x121   : > { %783 = vmatmul.mubr.bf16.vlgmr.msra.gmra.mrb[16].mxu0 %v516_v0 }
 0x1f4   : > { %v559_v3 = vpop.f32.mrb[16].mxu0 }
 0x1f5   : > { %v716_v4 = vmul.f32 -0.25, %v559_v3  ;;  %v784_v5 = vpop.f32.mrb[17].mxu0 }
 0x1f6   : > { %v562_v6 = vpop.f32.mrb[18].mxu0 }
 0x1f7   : > { %v567_v7 = vmul.f32 1.442695, %v716_v4  ;;  %v785_v8 = vpop.f32.mrb[19].mxu0 }
 0x1f9   : > { %853 = vpow2.f32 %v567_v7 }
 0x203   : > { %v854_v9 = vpop.eup %853 }
 0x204   : > { %v569_v10 = vadd.f32 1.0, %v854_v9 }
 0x206   : > { %855 = vrcp.f32 %v569_v10 }
 0x210   : > { %v856_v11 = vpop.eup %855 }
 0x211   : > { %vm572_vm3 = vcmp.gt.f32.partialorder %v856_v11, 0.5 }
 0x212   : > { %v573_v12 = vsel %vm572_vm3, %v856_v11, -1e+20 }
 0x213   : > { %v575_v1 = vsel %vm453_vm2, %v573_v12, -inf }
 0x214   : > { %576 = vmax.xlane.f32.xlu0 %v575_v1 }
 0x2a1   : > { %v577_v13 = vpop.xlane.xlu0 %576 }
 0x2a2   : > { %v578_v14 = vsub.f32 %v573_v12, %v577_v13 }
 0x2a4   : > { %v579_v15 = vpack.c.bf16 %v578_v14, %v578_v14 }
 0x2a6   : > { %v581_v16 = vmul.bf16 1069105081, %v579_v15 }
 0x2a8   : > { %857 = vpow.bf16 %v581_v16 }
 0x2b3   : > { %v858_v17 = vpop.eup %857 }
 0x2b4   : > { %v583_v18 = vunpack.c.l.bf16 %v858_v17 }
 0x2b6   : > { %v584_v19 = vsel %vm453_vm2, %v583_v18, 0.0 }
 0x2b7   : > { %585 = vadd.xlane.f32.xlu0 %v584_v19 }
 0x344   : > { %v586_v20 = vpop.xlane.xlu0 %585 }
 0x345   : > { %859 = vrcp.f32 %v586_v20 }
 0x34f   : > { %v860_v21 = vpop.eup %859 }
 0x350   : > { %v588_v22 = vmul.f32 %v860_v21, %v583_v18 }
 0x352   : > { %589 = vst.msk [vmem:[%s225_s24] sm:$0xff] %vm453_vm2, %v588_v22 }
 0x353   : > { %874 = shalt.err (!%p871_p5)
}
 0x354   : > { %s875_s10 = scalar_lea.hbm %s1099_s5, 128  ;;  %s879_s13 = scalar_lea.hbm %s1151_s4, 256 }
 0x355   : > { %p876_p6 = scmp.ne.s32.totalorder %s1099_s5, %s875_s10  ;;  %p880_p10 = scmp.lt.u32.totalorder %s1099_s5, %s1151_s4 }
 0x356   : > { %p881_p11 = scmp.lt.u32.totalorder %s879_s13, %s875_s10  ;;  %p883_p13 = scmp.lt.u32.totalorder %s875_s10, %s1099_s5 }
 0x357   : > { %p877_p7 = pnand %p876_p6, %p1009_p4 }
 0x358   : > { %p882_p12 = por %p881_p11, %p880_p10 }
 0x359   : > { %p878_p9 = pneg %p877_p7 }
 0x35a   : > { %p884_p0 = por %p883_p13, %p882_p12 }
 0x35c   : > { %p885_p1 = pnand %p884_p0, %p878_p9 }
 0x35e   : > { %888 = shalt.err (!%p885_p1)
}
 0x35f   : > { %786 = dma.vmem_to_hbm [thread:$0]  (%p1009_p4), %s1101_s26, 128, %s1099_s5, %s591_s6  }
 0x360 PF: > { %p792_p2 = scmp.ge.s32.totalorder %s939_s20, 2  ;;  %s617_s22 = sand.u32 1, %s919_s15  }
 0x361   : > { %s618_s24 = scalar_lea.sflag [#allocation4], %s617_s22 }
 0x362   : > { %p789_p3 = pnand %p792_p2, %p1016_p8 }
 0x364   : > { %914 = dma.done.wait (!%p789_p3), %s618_s24, 128  }
 0x365   : > { %916 = vsyncadd (!%p789_p3), %s618_s24, 4294967168  ;;  %s17_s20 = sadd.s32 1, %s939_s20   ;;  %s1154_s15 = smov %s923_s16 }
 0x366   : > { %p14_p5 = scmp.ge.s32.totalorder %s17_s20, 4   ;;  %s1155_s16 = smov %s927_s17 }
 0x367   : > { %s1156_s17 = smov %s1022_s28  ;;  %s1157_s18 = smov %s935_s19 }
 0x368   : > { %s1158_s19 = smov %s1160_s23  ;;  %16 = sbr.rel (!%p14_p5) target bundleno = 4 (0x4), region = 78 }
 0x36f   :  { %623 = vsyncpa [#allocation4], 1 }
 0x370   :  { %625 = vsyncpa [#allocation4 + $0x1], 1 }

</bundles_post_ra>
